<compile_context>
chip_gen: v7x
topology: tpu7x:2x2x1
jax: 0.10.0
libtpu: 0.0.40
codegen_flags: <defaults>
</compile_context>

<pallas_src>
import functools

import jax
import jax.numpy as jnp
from jax.experimental import pallas as pl
from jax.experimental.pallas import tpu as pltpu


def _round_up(x, m):
    return ((x + m - 1) // m) * m


def make_ncf_kernel(num_layers):
    """Builds the MLP-tower kernel for a given number of layers."""

    def kernel(*refs):
        # refs layout:
        #   eu, ei, w1u, w1i, b1, (w_i, b_i) * (num_layers - 1), wp, bp, out
        eu_ref, ei_ref, w1u_ref, w1i_ref, b1_ref = refs[:5]
        rest = refs[5:]
        out_ref = rest[-1]
        wp_ref, bp_ref = rest[-3], rest[-2]
        layer_refs = rest[:-3]

        # Layer 1: split-weight matmul replaces concat([eu, ei]) @ W1.
        # (nn.Dropout is identity in eval mode; no kernel op emitted.)
        acc = (jnp.dot(eu_ref[...], w1u_ref[...], preferred_element_type=jnp.float32)
               + jnp.dot(ei_ref[...], w1i_ref[...], preferred_element_type=jnp.float32)
               + b1_ref[...])
        # ReLU in f32, then immediately pack to bf16 for the next MXU matmul.
        h = jnp.maximum(acc, 0.0).astype(jnp.bfloat16)

        # Remaining MLP layers: bf16 MXU matmul, f32 accumulate, f32 ReLU,
        # bf16 repack.
        for li in range(num_layers - 1):
            w_ref = layer_refs[2 * li]
            b_ref = layer_refs[2 * li + 1]
            acc = jnp.dot(h, w_ref[...],
                          preferred_element_type=jnp.float32) + b_ref[...]
            h = jnp.maximum(acc, 0.0).astype(jnp.bfloat16)

        # predict_layer (Linear(factor_num, 1)): VPU multiply + lane reduction
        # instead of an N=1 MXU matmul.
        wp = wp_ref[...].astype(jnp.float32)                      # (1, F)
        out_ref[...] = (jnp.sum(h.astype(jnp.float32) * wp, axis=-1, keepdims=True)
                        + bp_ref[...])

    return kernel


def ncf_forward(user, item, params, *, num_layers=3, block_batch=2048):
    """Full NCF (model='MLP') forward: bf16 gather -> Pallas batch-tiled MLP kernel."""
    B = user.shape[0]
    E = params["embed_user"].shape[1]

    # Batch tile: multiple of 16 (bf16 sublane packing), up to block_batch rows.
    tb = min(block_batch, _round_up(B, 16))
    b_pad = _round_up(B, tb)
    # v7x has 2 TensorCores; make sure the "parallel" batch axis has >= 2 grid
    # steps whenever the batch is big enough to split.
    if b_pad // tb < 2 and tb >= 32:
        tb = _round_up(tb // 2, 16)
        b_pad = _round_up(B, tb)

    # Pad the tiny index vectors (index 0 = valid row) instead of the (B, E)
    # embedding arrays — the gather then produces the padded size directly.
    if b_pad != B:
        user = jnp.pad(user, (0, b_pad - B))
        item = jnp.pad(item, (0, b_pad - B))

    # Embedding lookups (XLA gather) on bf16 tables -> bf16 activations in HBM.
    eu = params["embed_user"][user]                               # (b_pad, E) bf16
    ei = params["embed_item"][item]                               # (b_pad, E) bf16

    # Kernel operands: pre-transposed / pre-cast weights from params.
    weight_args = [params["mlp_w0_user"], params["mlp_w0_item"], params["mlp_b0"]]
    for i in range(1, num_layers):
        weight_args += [params[f"mlp_w{i}"], params[f"mlp_b{i}"]]
    weight_args += [params["pred_w"], params["pred_b"]]

    # BlockSpecs: batch-tiled activations, grid-invariant (VMEM-resident) weights.
    act_spec = pl.BlockSpec((tb, E), lambda i: (i, 0))
    weight_specs = [
        pl.BlockSpec(w.shape, lambda i, _nd=w.ndim: (0,) * _nd)   # bind ndim now
        for w in weight_args
    ]
    out_spec = pl.BlockSpec((tb, 1), lambda i: (i, 0))

    pred = pl.pallas_call(
        make_ncf_kernel(num_layers),
        out_shape=jax.ShapeDtypeStruct((b_pad, 1), jnp.float32),
        grid=(b_pad // tb,),
        in_specs=[act_spec, act_spec] + weight_specs,
        out_specs=out_spec,
        compiler_params=pltpu.CompilerParams(
            dimension_semantics=("parallel",),
            vmem_limit_bytes=32 * 1024 * 1024),
    )(eu, ei, *weight_args)

    return pred.reshape(-1)[:B]                                   # prediction.view(-1)


def init_params(key, user_num, item_num, factor_num, num_layers):
    """Deterministic parameter init mirroring NCF._init_weight_ shapes.

    Embedding tables and Linear weights are stored kernel-ready: bf16,
    Linear weights transposed to (in, out), first layer pre-split into
    user/item halves. Biases stay f32 (added on the f32 accumulator).
    """
    emb_dim = factor_num * 2 ** (num_layers - 1)
    keys = jax.random.split(key, 2 + num_layers + 1)
    params = {
        "embed_user": (0.01 * jax.random.normal(keys[0], (user_num, emb_dim),
                                                jnp.float32)).astype(jnp.bfloat16),
        "embed_item": (0.01 * jax.random.normal(keys[1], (item_num, emb_dim),
                                                jnp.float32)).astype(jnp.bfloat16),
    }
    for i in range(num_layers):
        in_size = factor_num * 2 ** (num_layers - i)
        out_size = in_size // 2
        # Xavier-uniform-like deterministic init, PyTorch weight shape (out, in).
        limit = (6.0 / (in_size + out_size)) ** 0.5
        w = jax.random.uniform(keys[2 + i], (out_size, in_size), jnp.float32,
                               -limit, limit)
        w_t = w.T.astype(jnp.bfloat16)                            # (in, out)
        if i == 0:
            params["mlp_w0_user"] = w_t[:emb_dim]                 # (E, out)
            params["mlp_w0_item"] = w_t[emb_dim:]                 # (E, out)
        else:
            params[f"mlp_w{i}"] = w_t
        params[f"mlp_b{i}"] = jnp.zeros((1, out_size), jnp.float32)
    # predict_layer: Linear(factor_num, 1), kaiming-uniform-ish scale.
    limit = (3.0 / factor_num) ** 0.5
    params["pred_w"] = jax.random.uniform(
        keys[2 + num_layers], (1, factor_num), jnp.float32,
        -limit, limit).astype(jnp.bfloat16)
    params["pred_b"] = jnp.zeros((1, 1), jnp.float32)
    return params


def ncf_reference(user, item, params, num_layers):
    """Pure-JAX f32 reference on the same (bf16) parameters, for tolerance check."""
    eu = params["embed_user"][user].astype(jnp.float32)
    ei = params["embed_item"][item].astype(jnp.float32)
    h = jnp.concatenate([eu, ei], axis=-1)
    w1 = jnp.concatenate([params["mlp_w0_user"], params["mlp_w0_item"]],
                         axis=0).astype(jnp.float32)
    h = jnp.maximum(h @ w1 + params["mlp_b0"], 0.0)
    for i in range(1, num_layers):
        h = jnp.maximum(h @ params[f"mlp_w{i}"].astype(jnp.float32)
                        + params[f"mlp_b{i}"], 0.0)
    out = h @ params["pred_w"].astype(jnp.float32).T + params["pred_b"]
    return out.reshape(-1)


if __name__ == "__main__":
    # Small, forward-consistent config.
    user_num, item_num = 32, 48
    factor_num, num_layers = 32, 3          # emb_dim = 32 * 2^2 = 128
    batch = 8

    key = jax.random.PRNGKey(0)
    pkey, ukey, ikey = jax.random.split(key, 3)
    params = init_params(pkey, user_num, item_num, factor_num, num_layers)

    user = jax.random.randint(ukey, (batch,), 0, user_num, dtype=jnp.int32)
    item = jax.random.randint(ikey, (batch,), 0, item_num, dtype=jnp.int32)

    fwd = jax.jit(functools.partial(ncf_forward, num_layers=num_layers))
    pred = fwd(user, item, params)
    jax.block_until_ready(pred)

    assert pred.shape == (batch,) and pred.dtype == jnp.float32
    assert bool(jnp.all(jnp.isfinite(pred)))

    # bf16 kernel path vs f32 reference on the same parameters (loose tolerance:
    # bf16 intermediates, f32 accumulation — scores match to serving precision).
    ref = ncf_reference(user, item, params, num_layers)
    assert bool(jnp.allclose(pred, ref, atol=5e-2, rtol=5e-2))

    print("KERNEL_OK")
</pallas_src>

<mosaic_0001>
module attributes {stable_mosaic.version = 11 : i64} {
  func.func @kernel(%arg0: i32, %arg1: memref<16x128xbf16, #tpu.memory_space<vmem>>, %arg2: memref<16x128xbf16, #tpu.memory_space<vmem>>, %arg3: memref<128x128xbf16, #tpu.memory_space<vmem>>, %arg4: memref<128x128xbf16, #tpu.memory_space<vmem>>, %arg5: memref<1x128xf32, #tpu.memory_space<vmem>>, %arg6: memref<128x64xbf16, #tpu.memory_space<vmem>>, %arg7: memref<1x64xf32, #tpu.memory_space<vmem>>, %arg8: memref<64x32xbf16, #tpu.memory_space<vmem>>, %arg9: memref<1x32xf32, #tpu.memory_space<vmem>>, %arg10: memref<1x32xbf16, #tpu.memory_space<vmem>>, %arg11: memref<1x1xf32, #tpu.memory_space<vmem>>, %arg12: memref<16x1xf32, #tpu.memory_space<vmem>>) attributes {dimension_semantics = [#tpu.dimension_semantics<parallel>], iteration_bounds = array<i64: 1>, scalar_prefetch = 0 : i64, scratch_operands = 0 : i64, tpu.core_type = #tpu.core_type<tc>, window_params = [{transform_indices = @transform_0, window_bounds = array<i64: 16, 128>}, {transform_indices = @transform_1, window_bounds = array<i64: 16, 128>}, {pipeline_mode = #tpu.pipeline_mode<synchronous>, transform_indices = @transform_2, window_bounds = array<i64: 128, 128>}, {pipeline_mode = #tpu.pipeline_mode<synchronous>, transform_indices = @transform_3, window_bounds = array<i64: 128, 128>}, {pipeline_mode = #tpu.pipeline_mode<synchronous>, transform_indices = @transform_4, window_bounds = array<i64: 1, 128>}, {pipeline_mode = #tpu.pipeline_mode<synchronous>, transform_indices = @transform_5, window_bounds = array<i64: 128, 64>}, {pipeline_mode = #tpu.pipeline_mode<synchronous>, transform_indices = @transform_6, window_bounds = array<i64: 1, 64>}, {pipeline_mode = #tpu.pipeline_mode<synchronous>, transform_indices = @transform_7, window_bounds = array<i64: 64, 32>}, {pipeline_mode = #tpu.pipeline_mode<synchronous>, transform_indices = @transform_8, window_bounds = array<i64: 1, 32>}, {pipeline_mode = #tpu.pipeline_mode<synchronous>, transform_indices = @transform_9, window_bounds = array<i64: 1, 32>}, {pipeline_mode = #tpu.pipeline_mode<synchronous>, transform_indices = @transform_10, window_bounds = array<i64: 1, 1>}, {transform_indices = @transform_11, window_bounds = array<i64: 16, 1>}]} {
    %c0 = arith.constant 0 : index
    %c0_0 = arith.constant 0 : index
    %0 = vector.load %arg1[%c0, %c0_0] : memref<16x128xbf16, #tpu.memory_space<vmem>>, vector<16x128xbf16>
    %c0_1 = arith.constant 0 : index
    %c0_2 = arith.constant 0 : index
    %1 = vector.load %arg3[%c0_1, %c0_2] : memref<128x128xbf16, #tpu.memory_space<vmem>>, vector<128x128xbf16>
    %cst = arith.constant dense<0.000000e+00> : vector<16x128xf32>
    %2 = tpu.matmul %0, %1, %cst {dimension_numbers = #tpu.dot_dimension_numbers<[1], [0], [0], [1], [0, 0, 1, 1], [], []>} : vector<16x128xbf16>, vector<128x128xbf16>, vector<16x128xf32> -> vector<16x128xf32>
    %c0_3 = arith.constant 0 : index
    %c0_4 = arith.constant 0 : index
    %3 = vector.load %arg2[%c0_3, %c0_4] : memref<16x128xbf16, #tpu.memory_space<vmem>>, vector<16x128xbf16>
    %c0_5 = arith.constant 0 : index
    %c0_6 = arith.constant 0 : index
    %4 = vector.load %arg4[%c0_5, %c0_6] : memref<128x128xbf16, #tpu.memory_space<vmem>>, vector<128x128xbf16>
    %cst_7 = arith.constant dense<0.000000e+00> : vector<16x128xf32>
    %5 = tpu.matmul %3, %4, %cst_7 {dimension_numbers = #tpu.dot_dimension_numbers<[1], [0], [0], [1], [0, 0, 1, 1], [], []>} : vector<16x128xbf16>, vector<128x128xbf16>, vector<16x128xf32> -> vector<16x128xf32>
    %6 = arith.addf %2, %5 : vector<16x128xf32>
    %c0_8 = arith.constant 0 : index
    %c0_9 = arith.constant 0 : index
    %7 = vector.load %arg5[%c0_8, %c0_9] : memref<1x128xf32, #tpu.memory_space<vmem>>, vector<1x128xf32>
    %8 = vector.broadcast %7 : vector<1x128xf32> to vector<16x128xf32>
    %9 = arith.addf %6, %8 : vector<16x128xf32>
    %cst_10 = arith.constant 0.000000e+00 : f32
    %10 = vector.broadcast %cst_10 : f32 to vector<16x128xf32>
    %11 = arith.maximumf %9, %10 : vector<16x128xf32>
    %12 = arith.truncf %11 : vector<16x128xf32> to vector<16x128xbf16>
    %c0_11 = arith.constant 0 : index
    %c0_12 = arith.constant 0 : index
    %13 = vector.load %arg6[%c0_11, %c0_12] : memref<128x64xbf16, #tpu.memory_space<vmem>>, vector<128x64xbf16>
    %cst_13 = arith.constant dense<0.000000e+00> : vector<16x64xf32>
    %14 = tpu.matmul %12, %13, %cst_13 {dimension_numbers = #tpu.dot_dimension_numbers<[1], [0], [0], [1], [0, 0, 1, 1], [], []>} : vector<16x128xbf16>, vector<128x64xbf16>, vector<16x64xf32> -> vector<16x64xf32>
    %c0_14 = arith.constant 0 : index
    %c0_15 = arith.constant 0 : index
    %15 = vector.load %arg7[%c0_14, %c0_15] : memref<1x64xf32, #tpu.memory_space<vmem>>, vector<1x64xf32>
    %16 = vector.broadcast %15 : vector<1x64xf32> to vector<16x64xf32>
    %17 = arith.addf %14, %16 : vector<16x64xf32>
    %cst_16 = arith.constant 0.000000e+00 : f32
    %18 = vector.broadcast %cst_16 : f32 to vector<16x64xf32>
    %19 = arith.maximumf %17, %18 : vector<16x64xf32>
    %20 = arith.truncf %19 : vector<16x64xf32> to vector<16x64xbf16>
    %c0_17 = arith.constant 0 : index
    %c0_18 = arith.constant 0 : index
    %21 = vector.load %arg8[%c0_17, %c0_18] : memref<64x32xbf16, #tpu.memory_space<vmem>>, vector<64x32xbf16>
    %cst_19 = arith.constant dense<0.000000e+00> : vector<16x32xf32>
    %22 = tpu.matmul %20, %21, %cst_19 {dimension_numbers = #tpu.dot_dimension_numbers<[1], [0], [0], [1], [0, 0, 1, 1], [], []>} : vector<16x64xbf16>, vector<64x32xbf16>, vector<16x32xf32> -> vector<16x32xf32>
    %c0_20 = arith.constant 0 : index
    %c0_21 = arith.constant 0 : index
    %23 = vector.load %arg9[%c0_20, %c0_21] : memref<1x32xf32, #tpu.memory_space<vmem>>, vector<1x32xf32>
    %24 = vector.broadcast %23 : vector<1x32xf32> to vector<16x32xf32>
    %25 = arith.addf %22, %24 : vector<16x32xf32>
    %cst_22 = arith.constant 0.000000e+00 : f32
    %26 = vector.broadcast %cst_22 : f32 to vector<16x32xf32>
    %27 = arith.maximumf %25, %26 : vector<16x32xf32>
    %28 = arith.truncf %27 : vector<16x32xf32> to vector<16x32xbf16>
    %c0_23 = arith.constant 0 : index
    %c0_24 = arith.constant 0 : index
    %29 = vector.load %arg10[%c0_23, %c0_24] : memref<1x32xbf16, #tpu.memory_space<vmem>>, vector<1x32xbf16>
    %30 = arith.extf %29 : vector<1x32xbf16> to vector<1x32xf32>
    %31 = arith.extf %28 : vector<16x32xbf16> to vector<16x32xf32>
    %32 = vector.broadcast %30 : vector<1x32xf32> to vector<16x32xf32>
    %33 = arith.mulf %31, %32 : vector<16x32xf32>
    %cst_25 = arith.constant dense<0.000000e+00> : vector<16xf32>
    %34 = vector.multi_reduction <add>, %33, %cst_25 [1] : vector<16x32xf32> to vector<16xf32>
    %35 = vector.shape_cast %34 : vector<16xf32> to vector<16x1xf32>
    %c0_26 = arith.constant 0 : index
    %c0_27 = arith.constant 0 : index
    %36 = vector.load %arg11[%c0_26, %c0_27] : memref<1x1xf32, #tpu.memory_space<vmem>>, vector<1x1xf32>
    %37 = vector.broadcast %36 : vector<1x1xf32> to vector<16x1xf32>
    %38 = arith.addf %35, %37 : vector<16x1xf32>
    %c0_28 = arith.constant 0 : index
    %c0_29 = arith.constant 0 : index
    %39 = vector.load %arg12[%c0_28, %c0_29] : memref<16x1xf32, #tpu.memory_space<vmem>>, vector<16x1xf32>
    tpu.vector_store %arg12[%c0_28, %c0_29], %38 {strides = array<i32>} : memref<16x1xf32, #tpu.memory_space<vmem>>, vector<16x1xf32>,
    return
  }
  func.func @transform_0(%arg0: i32) -> (i32, i32) {
    %c0_i32 = arith.constant 0 : i32
    %c0_i32_0 = arith.constant 0 : i32
    return %arg0, %c0_i32 : i32, i32
  }
  func.func @transform_1(%arg0: i32) -> (i32, i32) {
    %c0_i32 = arith.constant 0 : i32
    %c0_i32_0 = arith.constant 0 : i32
    return %arg0, %c0_i32 : i32, i32
  }
  func.func @transform_2(%arg0: i32) -> (i32, i32) {
    %c0_i32 = arith.constant 0 : i32
    %c0_i32_0 = arith.constant 0 : i32
    %c0_i32_1 = arith.constant 0 : i32
    return %c0_i32, %c0_i32_0 : i32, i32
  }
  func.func @transform_3(%arg0: i32) -> (i32, i32) {
    %c0_i32 = arith.constant 0 : i32
    %c0_i32_0 = arith.constant 0 : i32
    %c0_i32_1 = arith.constant 0 : i32
    return %c0_i32, %c0_i32_0 : i32, i32
  }
  func.func @transform_4(%arg0: i32) -> (i32, i32) {
    %c0_i32 = arith.constant 0 : i32
    %c0_i32_0 = arith.constant 0 : i32
    %c0_i32_1 = arith.constant 0 : i32
    return %c0_i32, %c0_i32_0 : i32, i32
  }
  func.func @transform_5(%arg0: i32) -> (i32, i32) {
    %c0_i32 = arith.constant 0 : i32
    %c0_i32_0 = arith.constant 0 : i32
    %c0_i32_1 = arith.constant 0 : i32
    return %c0_i32, %c0_i32_0 : i32, i32
  }
  func.func @transform_6(%arg0: i32) -> (i32, i32) {
    %c0_i32 = arith.constant 0 : i32
    %c0_i32_0 = arith.constant 0 : i32
    %c0_i32_1 = arith.constant 0 : i32
    return %c0_i32, %c0_i32_0 : i32, i32
  }
  func.func @transform_7(%arg0: i32) -> (i32, i32) {
    %c0_i32 = arith.constant 0 : i32
    %c0_i32_0 = arith.constant 0 : i32
    %c0_i32_1 = arith.constant 0 : i32
    return %c0_i32, %c0_i32_0 : i32, i32
  }
  func.func @transform_8(%arg0: i32) -> (i32, i32) {
    %c0_i32 = arith.constant 0 : i32
    %c0_i32_0 = arith.constant 0 : i32
    %c0_i32_1 = arith.constant 0 : i32
    return %c0_i32, %c0_i32_0 : i32, i32
  }
  func.func @transform_9(%arg0: i32) -> (i32, i32) {
    %c0_i32 = arith.constant 0 : i32
    %c0_i32_0 = arith.constant 0 : i32
    %c0_i32_1 = arith.constant 0 : i32
    return %c0_i32, %c0_i32_0 : i32, i32
  }
  func.func @transform_10(%arg0: i32) -> (i32, i32) {
    %c0_i32 = arith.constant 0 : i32
    %c0_i32_0 = arith.constant 0 : i32
    %c0_i32_1 = arith.constant 0 : i32
    return %c0_i32, %c0_i32_0 : i32, i32
  }
  func.func @transform_11(%arg0: i32) -> (i32, i32) {
    %c0_i32 = arith.constant 0 : i32
    %c0_i32_0 = arith.constant 0 : i32
    return %arg0, %c0_i32 : i32, i32
  }
}

</mosaic_0001>

<bundles_post_ra>
// kernel: ncf_forward.1
= control target key start
LH: loop header
LB: loop body
LE: loop exit
PB: predicated region body
PF: predicated region fallthrough
CT: control target
= control target key end

     0   :  { %v685_v0 = vmov 0.0   ;;  %vm686_vm0 = vmmov 0   ;;  %vm433_vm1 = vcmask 523264   ;;  %v485_v58 = vlaneseq  ;;  %s894_s3 = inlined_call_operand.vmem [shape: bf16[128,128], index: 3, kind: input, shape index: {}]   ;;  %s895_s2 = inlined_call_operand.vmem [shape: bf16[128,128], index: 2, kind: input, shape index: {}]   ;;  %s896_s1 = inlined_call_operand.vmem [shape: bf16[16,128], index: 1, kind: input, shape index: {}]   ;;  %s897_s0 = inlined_call_operand.vmem [shape: bf16[16,128], index: 0, kind: input, shape index: {}]   ;;  %s898_s5 = inlined_call_operand.vmem [shape: bf16[128,64], index: 5, kind: input, shape index: {}]   ;;  %s899_s7 = inlined_call_operand.vmem [shape: bf16[64,32], index: 7, kind: input, shape index: {}]   ;;  %s900_s4 = inlined_call_operand.vmem [shape: f32[1,128], index: 4, kind: input, shape index: {}]   ;;  %s901_s6 = inlined_call_operand.vmem [shape: f32[1,64], index: 6, kind: input, shape index: {}]   ;;  %s902_s10 = inlined_call_operand.<no memory space> [shape: f32[1,1], index: 10, kind: input, shape index: {}]   ;;  %s903_s8 = inlined_call_operand.vmem [shape: f32[1,32], index: 8, kind: input, shape index: {}]   ;;  %s904_s9 = inlined_call_operand.vmem [shape: bf16[1,32], index: 9, kind: input, shape index: {}]   ;;  %s905_s11 = inlined_call_operand.vmem [shape: f32[16,1], index: 11, kind: output, shape index: {}]  }
   0x1   :  { %581 = vmatprep.subr.bf16.mxu0 %v685_v0  ;;  %601 = vmatprep.subr.bf16.mxu1 %v685_v0  ;;  %v655_v1 = vld [vmem:[%s894_s3] sm:$0xff]   ;;  %v657_v3 = vld [vmem:[%s894_s3 + $0x8] sm:$0xff]   ;;  %v659_v5 = vld [vmem:[%s894_s3 + $0x10] sm:$0xff]   ;;  %v16_v57 = vstv %s902_s10  ;;  %vm491_vm2 = vcmask 261120   ;;  %vm507_vm3 = vcmask 7168  }
   0x2   :  { %v656_v2 = vld [vmem:[%s895_s2] sm:$0xff]   ;;  %597 = vmatprep.mubr.msk.bf16.mxu0 %vm686_vm0, %v685_v0  ;;  %617 = vmatprep.mubr.msk.bf16.mxu1 %vm686_vm0, %v685_v0  ;;  %v658_v4 = vld [vmem:[%s895_s2 + $0x8] sm:$0xff]   ;;  %v660_v6 = vld [vmem:[%s895_s2 + $0x10] sm:$0xff]   ;;  %17 = vst [vmem:[#allocation2] sm:$0x1] %v16_v57  ;;  %v486_v60 = vshrl.u32 %v485_v58, 7 }
   0x3   :  { %582 = vmatpush3.bf16.msra.mxu0 %v655_v1  ;;  %602 = vmatpush3.bf16.msra.mxu1 %v656_v2  ;;  %v661_v7 = vld [vmem:[%s894_s3 + $0x18] sm:$0xff]   ;;  %v663_v9 = vld [vmem:[%s894_s3 + $0x20] sm:$0xff]   ;;  %v665_v11 = vld [vmem:[%s894_s3 + $0x28] sm:$0xff]  }
   0x4   :  { %583 = vmatprep.subr.bf16.mxu0 %v685_v0  ;;  %603 = vmatprep.subr.bf16.mxu1 %v685_v0  ;;  %v662_v8 = vld [vmem:[%s895_s2 + $0x18] sm:$0xff]   ;;  %v664_v10 = vld [vmem:[%s895_s2 + $0x20] sm:$0xff]   ;;  %v666_v12 = vld [vmem:[%s895_s2 + $0x28] sm:$0xff]  }
   0x5   :  { %v667_v13 = vld [vmem:[%s894_s3 + $0x30] sm:$0xff]   ;;  %v669_v15 = vld [vmem:[%s894_s3 + $0x38] sm:$0xff]   ;;  %v671_v17 = vld [vmem:[%s896_s1] sm:$0xff]  }
   0x6   :  { %v668_v14 = vld [vmem:[%s895_s2 + $0x30] sm:$0xff]   ;;  %v670_v16 = vld [vmem:[%s895_s2 + $0x38] sm:$0xff]   ;;  %v672_v18 = vld [vmem:[%s897_s0] sm:$0xff]  }
   0x7   :  { %584 = vmatpush3.bf16.msra.mxu0 %v657_v3  ;;  %604 = vmatpush3.bf16.msra.mxu1 %v658_v4  ;;  %v673_v19 = vld [vmem:[%s898_s5] sm:$0xff]   ;;  %v674_v20 = vld [vmem:[%s898_s5 + $0x8] sm:$0xff]   ;;  %v675_v21 = vld [vmem:[%s898_s5 + $0x10] sm:$0xff]  }
   0x8   :  { %585 = vmatprep.subr.bf16.mxu0 %v685_v0  ;;  %605 = vmatprep.subr.bf16.mxu1 %v685_v0  ;;  %v676_v22 = vld [vmem:[%s898_s5 + $0x18] sm:$0xff]   ;;  %v677_v23 = vld [vmem:[%s898_s5 + $0x20] sm:$0xff]   ;;  %v678_v24 = vld [vmem:[%s898_s5 + $0x28] sm:$0xff]  }
   0x9   :  { %v679_v25 = vld [vmem:[%s898_s5 + $0x30] sm:$0xff]   ;;  %v680_v26 = vld [vmem:[%s898_s5 + $0x38] sm:$0xff]   ;;  %v681_v27 = vld [vmem:[%s899_s7] sm:$0xff]  }
   0xa   :  { %v682_v28 = vld [vmem:[%s899_s7 + $0x8] sm:$0xff]   ;;  %v532_v31 = vld [vmem:[%s900_s4] ss:$0 sm:$0xff]  ;;  %v683_v45 = vld [vmem:[%s899_s7 + $0x10] sm:$0xff]  }
   0xb   :  { %586 = vmatpush3.bf16.msra.mxu0 %v659_v5  ;;  %606 = vmatpush3.bf16.msra.mxu1 %v660_v6  ;;  %v684_v46 = vld [vmem:[%s899_s7 + $0x18] sm:$0xff]   ;;  %v533_v47 = vld [vmem:[%s901_s6] ss:$0 sm:$0xff]  ;;  %v487_v5 = vsub.s32 0, %v486_v60 }
   0xc   :  { %587 = vmatprep.subr.bf16.mxu0 %v685_v0  ;;  %607 = vmatprep.subr.bf16.mxu1 %v685_v0  ;;  %v542_v59 = vld [vmem:[%s903_s8] ss:$0 sm:$0xff] }
   0xd   :  { %v481_v62 = vld [vmem:[%s904_s9] sm:$0x1] }
   0xe   :  { %v482_v4 = vunpack.c.l.bf16 %v481_v62 }
   0xf   :  { %588 = vmatpush3.bf16.msra.mxu0 %v661_v7  ;;  %608 = vmatpush3.bf16.msra.mxu1 %v662_v8 }
  0x10   :  { %589 = vmatprep.subr.bf16.mxu0 %v685_v0  ;;  %609 = vmatprep.subr.bf16.mxu1 %v685_v0 }
  0x13   :  { %590 = vmatpush3.bf16.msra.mxu0 %v663_v9  ;;  %610 = vmatpush3.bf16.msra.mxu1 %v664_v10  ;;  %v488_v9 = vrot.slane %v482_v4, %v487_v5 }
  0x14   :  { %591 = vmatprep.subr.bf16.mxu0 %v685_v0  ;;  %611 = vmatprep.subr.bf16.mxu1 %v685_v0 }
  0x17   :  { %592 = vmatpush3.bf16.msra.mxu0 %v665_v11  ;;  %612 = vmatpush3.bf16.msra.mxu1 %v666_v12 }
  0x18   :  { %593 = vmatprep.subr.bf16.mxu0 %v685_v0  ;;  %613 = vmatprep.subr.bf16.mxu1 %v685_v0 }
  0x1b   :  { %594 = vmatpush3.bf16.msra.mxu0 %v667_v13  ;;  %614 = vmatpush3.bf16.msra.mxu1 %v668_v14 }
  0x1c   :  { %595 = vmatprep.subr.bf16.mxu0 %v685_v0  ;;  %615 = vmatprep.subr.bf16.mxu1 %v685_v0 }
  0x1f   :  { %596 = vmatpush3.bf16.msra.mxu0 %v669_v15  ;;  %616 = vmatpush3.bf16.msra.mxu1 %v670_v16  ;;  %v548_v16 = vld [vmem:[#allocation2] ss:$0 sm:$0xff] }
  0x20   :  { %621 = vmatprep.subr.bf16.mxu0 %v685_v0  ;;  %641 = vmatprep.subr.bf16.mxu1 %v685_v0 }
  0x22   :  { %598 = vmatmul.mubr.bf16.vlgmr.msra.gmra.mrb[0].mxu0 %v671_v17  ;;  %618 = vmatmul.mubr.bf16.vlgmr.msra.gmra.mrb[0].mxu1 %v672_v18 }
  0x23   :  { %622 = vmatpush3.bf16.msra.mxu0 %v673_v19  ;;  %637 = vmatprep.mubr.msk.bf16.mxu0 %vm686_vm0, %v685_v0 }
  0x24   :  { %623 = vmatprep.subr.bf16.mxu0 %v685_v0  ;;  %649 = vmatprep.mubr.msk.bf16.mxu1 %vm686_vm0, %v685_v0 }
  0x25   :  { %642 = vmatpush3.bf16.msra.mxu1 %v681_v27 }
  0x26   :  { %643 = vmatprep.subr.bf16.mxu1 %v685_v0 }
  0x27   :  { %624 = vmatpush3.bf16.msra.mxu0 %v674_v20 }
  0x28   :  { %625 = vmatprep.subr.bf16.mxu0 %v685_v0 }
  0x29   :  { %644 = vmatpush3.bf16.msra.mxu1 %v682_v28 }
  0x2a   :  { %645 = vmatprep.subr.bf16.mxu1 %v685_v0 }
  0x2b   :  { %626 = vmatpush3.bf16.msra.mxu0 %v675_v21 }
  0x2c   :  { %627 = vmatprep.subr.bf16.mxu0 %v685_v0 }
  0x2d   :  { %646 = vmatpush3.bf16.msra.mxu1 %v683_v45 }
  0x2e   :  { %647 = vmatprep.subr.bf16.mxu1 %v685_v0 }
  0x2f   :  { %628 = vmatpush3.bf16.msra.mxu0 %v676_v22 }
  0x30   :  { %629 = vmatprep.subr.bf16.mxu0 %v685_v0 }
  0x31   :  { %648 = vmatpush3.bf16.msra.mxu1 %v684_v46 }
  0x33   :  { %630 = vmatpush3.bf16.msra.mxu0 %v677_v23 }
  0x34   :  { %631 = vmatprep.subr.bf16.mxu0 %v685_v0 }
  0x37   :  { %632 = vmatpush3.bf16.msra.mxu0 %v678_v24 }
  0x38   :  { %633 = vmatprep.subr.bf16.mxu0 %v685_v0 }
  0x3b   :  { %634 = vmatpush3.bf16.msra.mxu0 %v679_v25 }
  0x3c   :  { %635 = vmatprep.subr.bf16.mxu0 %v685_v0 }
  0x3f   :  { %636 = vmatpush3.bf16.msra.mxu0 %v680_v26 }
  0xf5   :  { %v165_v29 = vpop.f32.mrb[0].mxu0  ;;  %v260_v30 = vpop.f32.mrb[0].mxu1 }
  0xf6   :  { %v599_v32 = vpop.f32.mrb[1].mxu0  ;;  %v261_v33 = vadd.f32 %v260_v30, %v165_v29  ;;  %v619_v34 = vpop.f32.mrb[1].mxu1 }
  0xf7   :  { %v168_v35 = vpop.f32.mrb[2].mxu0  ;;  %v263_v36 = vpop.f32.mrb[2].mxu1 }
  0xf8   :  { %v600_v37 = vpop.f32.mrb[3].mxu0  ;;  %v274_v38 = vadd.f32 %v532_v31, %v261_v33  ;;  %v264_v39 = vadd.f32 %v263_v36, %v168_v35  ;;  %v620_v40 = vpop.f32.mrb[3].mxu1 }
  0xfa   :  { %v275_v41 = vadd.f32 %v532_v31, %v264_v39  ;;  %v276_v42 = vmax.f32 %v274_v38, 0.0 }
  0xfc   :  { %v277_v43 = vmax.f32 %v275_v41, 0.0 }
  0xfe   :  { %v278_v44 = vpack.c.bf16 %v277_v43, %v276_v42 }
 0x100   :  { %638 = vmatmul.mubr.bf16.vlgmr.msra.gmra.mrb[4].mxu0 %v278_v44 }
 0x1d3   :  { %v384_v48 = vpop.f32.mrb[4].mxu0 }
 0x1d4   :  { %v385_v49 = vadd.f32 %v533_v47, %v384_v48  ;;  %v639_v50 = vpop.f32.mrb[5].mxu0 }
 0x1d5   :  { %v387_v51 = vpop.f32.mrb[6].mxu0 }
 0x1d6   :  { %v388_v52 = vadd.f32 %v533_v47, %v387_v51  ;;  %v640_v53 = vpop.f32.mrb[7].mxu0  ;;  %v391_v54 = vmax.f32 %v385_v49, 0.0 }
 0x1d8   :  { %v392_v55 = vmax.f32 %v388_v52, 0.0 }
 0x1da   :  { %v393_v56 = vpack.c.bf16 %v392_v55, %v391_v54 }
 0x1dc   :  { %650 = vmatmul.mubr.msk.bf16.vlgmr.msra.gmra.mrb[4].mxu1 %vm433_vm1, %v393_v56 }
 0x2af   :  { %v471_v61 = vpop.f32.mrb[4].mxu1 }
 0x2b0   :  { %v472_v63 = vadd.f32 %v542_v59, %v471_v61  ;;  %v651_v0 = vpop.f32.mrb[5].mxu1 }
 0x2b1   :  { %v474_v1 = vpop.f32.mrb[6].mxu1 }
 0x2b2   :  { %v475_v2 = vadd.f32 %v542_v59, %v474_v1  ;;  %v652_v3 = vpop.f32.mrb[7].mxu1  ;;  %v478_v6 = vmax.f32 %v472_v63, 0.0 }
 0x2b4   :  { %v479_v7 = vmax.f32 %v475_v2, 0.0 }
 0x2b6   :  { %v480_v8 = vpack.c.bf16 %v479_v7, %v478_v6 }
 0x2b8   :  { %v483_v10 = vunpack.c.l.bf16 %v480_v8  ;;  %v484_v11 = vunpack.c.h.bf16 %v480_v8 }
 0x2ba   :  { %v489_v12 = vmul.f32 %v488_v9, %v483_v10  ;;  %v490_v14 = vmul.f32 %v488_v9, %v484_v11 }
 0x2bc   :  { %v492_v13 = vsel %vm491_vm2, %v489_v12, 0.0  ;;  %v495_v15 = vsel %vm491_vm2, %v490_v14, 0.0 }
 0x2bd   :  { %493 = vadd.xlane.f32.xlu0 %v492_v13 }
 0x2c1   :  { %496 = vadd.xlane.f32.xlu0 %v495_v15 }
 0x34a   :  { %v494_v17 = vpop.xlane.xlu0 %493 }
 0x34b   :  { %v505_v18 = vadd.f32 %v548_v16, %v494_v17 }
 0x34d   :  { %508 = vst.msk [vmem:[%s905_s11] sm:$0xff] %vm507_vm3, %v505_v18 }
 0x34e   :  { %v497_v19 = vpop.xlane.xlu0 %496 }
 0x34f   :  { %v506_v20 = vadd.f32 %v548_v16, %v497_v19 }
 0x351   :  { %509 = vst.msk [vmem:[%s905_s11 + $0x8] sm:$0xff] %vm507_vm3, %v506_v20 }

</bundles_post_ra>
